<compile_context>
chip_gen: v7x
topology: tpu7x:2x2x1
jax: 0.10.0
libtpu: 0.0.40
codegen_flags: <defaults>
</compile_context>

<pallas_src>
import functools

import jax
import jax.numpy as jnp
from jax.experimental import pallas as pl
from jax.experimental.pallas import tpu as pltpu

_MIB = 1024 * 1024


def _label_smoothing_kernel(pred_ref, tgt_ref, out_ref, *, n_classes, smoothing):
    confidence = 1.0 - smoothing
    off = smoothing / (n_classes - 1)

    # ----- log-softmax pieces for this row tile (all math in f32) -----
    x = pred_ref[...].astype(jnp.float32)                           # (TB, C)
    m = jnp.max(x, axis=-1, keepdims=True)                          # (TB, 1)
    shifted = x - m                                                  # (TB, C)
    lse = jnp.log(jnp.sum(jnp.exp(shifted), axis=-1, keepdims=True))  # (TB, 1)

    # ----- fused weighted reduction: one (TB, C) pass -----
    tgt = tgt_ref[...]                                               # (TB, 1) int32
    col = jax.lax.broadcasted_iota(jnp.int32, (1, n_classes), 1)     # (1, C)
    w = jnp.where(col == tgt, jnp.float32(confidence), jnp.float32(off))  # (TB, C)

    # row_loss = sum_c(-true_dist * logp) = lse - sum_c(w * shifted)
    out_ref[...] = lse - jnp.sum(shifted * w, axis=-1, keepdims=True)


def _vmem_capacity_bytes():
    """Best-effort physical VMEM query; None if unavailable."""
    try:
        info = pltpu.get_tpu_info()
    except Exception:
        return None
    for name in ("vmem_capacity_bytes", "vmem_bytes", "vmem_size_bytes"):
        v = getattr(info, name, None)
        if v:
            return int(v)
    return None


def _vmem_budgets():
    """(compute_budget_bytes, vmem_limit_bytes), generation-aware."""
    cap = _vmem_capacity_bytes()
    if cap is not None and cap > 64 * _MIB:
        # v5e / v6e: 128 MiB physical VMEM per TensorCore.
        return 40 * _MIB, 64 * _MIB
    # v7x (64 MiB physical) or unknown: stay conservative.
    return 18 * _MIB, 36 * _MIB


def _choose_tile_rows(n, c, itemsize, budget_bytes):
    """Largest multiple-of-8 row tile whose working set fits the VMEM budget.

    Working set per element ~= 2*itemsize (double-buffered pred block)
    + ~12 B of f32 intermediates (shifted / exp / weighted product).
    """
    bytes_per_elem = 2 * itemsize + 12
    tr = budget_bytes // max(1, c * bytes_per_elem)
    tr = max(8, min(int(tr), 32768))
    tr = (tr // 8) * 8
    n_up8 = ((n + 7) // 8) * 8                 # never tile wider than the batch
    return max(8, min(tr, n_up8))


def label_smoothing_loss(pred, target, *, smoothing=0.1, tile_rows=None):
    """pred: (N, C) float (f32 or bf16); target: (N,) int. Returns scalar f32 loss."""
    n, c = pred.shape
    itemsize = jnp.dtype(pred.dtype).itemsize

    budget_bytes, vmem_limit_bytes = _vmem_budgets()
    if tile_rows is None:
        tile_rows = _choose_tile_rows(n, c, itemsize, budget_bytes)
    assert tile_rows > 0 and tile_rows % 8 == 0, "tile_rows must be a multiple of 8"

    n_pad = pl.cdiv(n, tile_rows) * tile_rows
    if n_pad != n:
        pred = jnp.pad(pred, ((0, n_pad - n), (0, 0)))
        target = jnp.pad(target, (0, n_pad - n))
    tgt2d = target.astype(jnp.int32).reshape(n_pad, 1)

    num_tiles = n_pad // tile_rows

    kernel = functools.partial(
        _label_smoothing_kernel, n_classes=c, smoothing=smoothing)

    cost = pl.CostEstimate(
        flops=int(6 * n_pad * c),
        transcendentals=int(n_pad * c + n_pad),
        bytes_accessed=int(n_pad * c * itemsize + n_pad * 4 + n_pad * 4),
    )

    per_row = pl.pallas_call(
        kernel,
        out_shape=jax.ShapeDtypeStruct((n_pad, 1), jnp.float32),
        grid_spec=pltpu.PrefetchScalarGridSpec(
            num_scalar_prefetch=0,
            grid=(num_tiles,),
            in_specs=[
                # pred: one big row tile per grid step (double-buffered by Pallas)
                pl.BlockSpec((tile_rows, c), lambda i: (i, 0)),
                # target: blocked per tile (tiny, avoids a resident full-array copy)
                pl.BlockSpec((tile_rows, 1), lambda i: (i, 0)),
            ],
            out_specs=pl.BlockSpec((tile_rows, 1), lambda i: (i, 0)),
        ),
        compiler_params=pltpu.CompilerParams(
            dimension_semantics=("parallel",),      # independent per-tile outputs
            vmem_limit_bytes=vmem_limit_bytes,      # generation-aware
        ),
        cost_estimate=cost,
    )(pred, tgt2d)

    # Final reduction (and masking of padded rows) in plain JAX.
    return jnp.sum(per_row[:n, 0]) / jnp.float32(n)


def _reference(pred, target, smoothing, n_classes):
    logp = jax.nn.log_softmax(pred.astype(jnp.float32), axis=-1)
    confidence = 1.0 - smoothing
    off = smoothing / (n_classes - 1)
    one_hot = jax.nn.one_hot(target, n_classes, dtype=jnp.float32)
    true_dist = one_hot * confidence + (1.0 - one_hot) * off
    return jnp.mean(jnp.sum(-true_dist * logp, axis=-1))


if __name__ == "__main__":
    key = jax.random.PRNGKey(0)
    k1, k2, k3, k4 = jax.random.split(key, 4)
    SMOOTHING = 0.1

    # Case 1: small, tile-aligned batch (auto tile size -> single tile).
    N, C = 16, 32
    pred = jax.random.normal(k1, (N, C), dtype=jnp.float32)
    target = jax.random.randint(k2, (N,), 0, C, dtype=jnp.int32)
    loss = jax.block_until_ready(
        label_smoothing_loss(pred, target, smoothing=SMOOTHING))
    ref = _reference(pred, target, SMOOTHING, C)
    assert jnp.allclose(loss, ref, rtol=1e-5, atol=1e-5), (loss, ref)

    # Case 2: ragged batch, non-multiple-of-128 classes, multi-tile parallel grid.
    N2, C2 = 37, 40
    pred2 = jax.random.normal(k3, (N2, C2), dtype=jnp.float32)
    target2 = jax.random.randint(k4, (N2,), 0, C2, dtype=jnp.int32)
    loss2 = jax.block_until_ready(
        label_smoothing_loss(pred2, target2, smoothing=SMOOTHING, tile_rows=8))
    ref2 = _reference(pred2, target2, SMOOTHING, C2)
    assert jnp.allclose(loss2, ref2, rtol=1e-5, atol=1e-5), (loss2, ref2)

    print("KERNEL_OK")
</pallas_src>

<mosaic_0001>
module attributes {stable_mosaic.version = 11 : i64} {
  func.func @_label_smoothing_kernel(%arg0: i32, %arg1: memref<16x32xf32, #tpu.memory_space<vmem>>, %arg2: memref<16x1xi32, #tpu.memory_space<vmem>>, %arg3: memref<16x1xf32, #tpu.memory_space<vmem>>) attributes {dimension_semantics = [#tpu.dimension_semantics<parallel>], iteration_bounds = array<i64: 1>, scalar_prefetch = 0 : i64, scratch_operands = 0 : i64, tpu.core_type = #tpu.core_type<tc>, window_params = [{transform_indices = @transform_0, window_bounds = array<i64: 16, 32>}, {transform_indices = @transform_1, window_bounds = array<i64: 16, 1>}, {transform_indices = @transform_2, window_bounds = array<i64: 16, 1>}]} {
    %c0 = arith.constant 0 : index
    %c0_0 = arith.constant 0 : index
    %0 = vector.load %arg1[%c0, %c0_0] : memref<16x32xf32, #tpu.memory_space<vmem>>, vector<16x32xf32>
    %cst = arith.constant dense<0xFF800000> : vector<16xf32>
    %1 = vector.multi_reduction <maximumf>, %0, %cst [1] : vector<16x32xf32> to vector<16xf32>
    %2 = vector.shape_cast %1 : vector<16xf32> to vector<16x1xf32>
    %3 = vector.broadcast %2 : vector<16x1xf32> to vector<16x32xf32>
    %4 = arith.subf %0, %3 : vector<16x32xf32>
    %5 = math.exp %4 : vector<16x32xf32>
    %cst_1 = arith.constant dense<0.000000e+00> : vector<16xf32>
    %6 = vector.multi_reduction <add>, %5, %cst_1 [1] : vector<16x32xf32> to vector<16xf32>
    %7 = vector.shape_cast %6 : vector<16xf32> to vector<16x1xf32>
    %8 = math.log %7 : vector<16x1xf32>
    %c0_2 = arith.constant 0 : index
    %c0_3 = arith.constant 0 : index
    %9 = vector.load %arg2[%c0_2, %c0_3] : memref<16x1xi32, #tpu.memory_space<vmem>>, vector<16x1xi32>
    %10 = tpu.iota {dimensions = array<i32: 1>} : vector<1x32xi32>
    %11 = vector.broadcast %10 : vector<1x32xi32> to vector<16x32xi32>
    %12 = vector.broadcast %9 : vector<16x1xi32> to vector<16x32xi32>
    %13 = arith.cmpi eq, %11, %12 : vector<16x32xi32>
    %cst_4 = arith.constant 0.899999976 : f32
    %cst_5 = arith.constant 0.0032258064 : f32
    %14 = vector.broadcast %cst_4 : f32 to vector<16x32xf32>
    %15 = vector.broadcast %cst_5 : f32 to vector<16x32xf32>
    %16 = arith.select %13, %14, %15 : vector<16x32xi1>, vector<16x32xf32>
    %17 = arith.mulf %4, %16 : vector<16x32xf32>
    %cst_6 = arith.constant dense<0.000000e+00> : vector<16xf32>
    %18 = vector.multi_reduction <add>, %17, %cst_6 [1] : vector<16x32xf32> to vector<16xf32>
    %19 = vector.shape_cast %18 : vector<16xf32> to vector<16x1xf32>
    %20 = arith.subf %8, %19 : vector<16x1xf32>
    %c0_7 = arith.constant 0 : index
    %c0_8 = arith.constant 0 : index
    %21 = vector.load %arg3[%c0_7, %c0_8] : memref<16x1xf32, #tpu.memory_space<vmem>>, vector<16x1xf32>
    tpu.vector_store %arg3[%c0_7, %c0_8], %20 {strides = array<i32>} : memref<16x1xf32, #tpu.memory_space<vmem>>, vector<16x1xf32>,
    return
  }
  func.func @transform_0(%arg0: i32) -> (i32, i32) {
    %c0_i32 = arith.constant 0 : i32
    %c0_i32_0 = arith.constant 0 : i32
    return %arg0, %c0_i32 : i32, i32
  }
  func.func @transform_1(%arg0: i32) -> (i32, i32) {
    %c0_i32 = arith.constant 0 : i32
    %c0_i32_0 = arith.constant 0 : i32
    return %arg0, %c0_i32 : i32, i32
  }
  func.func @transform_2(%arg0: i32) -> (i32, i32) {
    %c0_i32 = arith.constant 0 : i32
    %c0_i32_0 = arith.constant 0 : i32
    return %arg0, %c0_i32 : i32, i32
  }
}

</mosaic_0001>

<bundles_post_ra>
// kernel: tpu_custom_call.1
= control target key start
LH: loop header
LB: loop body
LE: loop exit
PB: predicated region body
PF: predicated region fallthrough
CT: control target
= control target key end

     0   :  { %vm13_vm0 = vcmask 261120   ;;  %v79_v2 = vmov 0   ;;  %v38_v9 = vlaneseq  ;;  %v80_v17 = vmov 0.0032258064   ;;  %s120_s0 = inlined_call_operand.vmem [shape: f32[16,32], index: 0, kind: input, shape index: {}]   ;;  %s121_s1 = inlined_call_operand.vmem [shape: s32[16,1], index: 1, kind: input, shape index: {}]   ;;  %s122_s2 = inlined_call_operand.vmem [shape: f32[16,1], index: 2, kind: output, shape index: {}]  }
   0x1   :  { %v11_v0 = vld [vmem:[%s120_s0] sm:$0xff]  ;;  %v12_v1 = vld [vmem:[%s120_s0 + $0x8] sm:$0xff]  ;;  %69 = vset.pattern.permute.xlu1 %v79_v2  ;;  %70 = vset.pattern.permute.xlu0 %v79_v2  ;;  %vm60_vm3 = vcmask 7168  }
   0x2   :  { %v36_v3 = vld [vmem:[%s121_s1] sm:$0xff]  ;;  %v14_v4 = vsel %vm13_vm0, %v11_v0, -inf  ;;  %v37_v5 = vld [vmem:[%s121_s1 + $0x8] sm:$0xff]  ;;  %v17_v6 = vsel %vm13_vm0, %v12_v1, -inf  ;;  %v39_v14 = vand.u32 127, %v38_v9 }
   0x3   :  { %41 = vperm.xlu1 %69, %v36_v3   ;;  %15 = vmax.xlane.f32.xlu0 %v14_v4 }
   0x7   :  { %44 = vperm.xlu1 %69, %v37_v5   ;;  %18 = vmax.xlane.f32.xlu0 %v17_v6 }
  0x82   :  { %v42_v12 = vpop.permute.xlu1 %41 }
  0x83   :  { %vm46_vm1 = vcmp.eq.s32.totalorder %v39_v14, %v42_v12 }
  0x84   :  { %v48_v18 = vsel %vm46_vm1, 0.9, %v80_v17 }
  0x86   :  { %v45_v16 = vpop.permute.xlu1 %44 }
  0x87   :  { %vm47_vm2 = vcmp.eq.s32.totalorder %v39_v14, %v45_v16 }
  0x88   :  { %v49_v22 = vsel %vm47_vm2, 0.9, %v80_v17 }
  0x90   :  { %v16_v7 = vpop.xlane.xlu0 %15 }
  0x91   :  { %v20_v8 = vsub.f32 %v11_v0, %v16_v7 }
  0x93   :  { %v22_v10 = vmul.f32 1.442695, %v20_v8  ;;  %v50_v21 = vmul.f32 %v48_v18, %v20_v8 }
  0x94   :  { %v19_v11 = vpop.xlane.xlu0 %18 }
  0x95   :  { %71 = vpow2.f32 %v22_v10  ;;  %v21_v13 = vsub.f32 %v12_v1, %v19_v11  ;;  %v52_v24 = vsel %vm13_vm0, %v50_v21, 0.0 }
  0x97   :  { %v24_v15 = vmul.f32 1.442695, %v21_v13  ;;  %v51_v26 = vmul.f32 %v49_v22, %v21_v13 }
  0x99   :  { %73 = vpow2.f32 %v24_v15  ;;  %v55_v27 = vsel %vm13_vm0, %v51_v26, 0.0 }
  0x9f   :  { %v72_v19 = vpop.eup %71 }
  0xa0   :  { %v26_v20 = vsel %vm13_vm0, %v72_v19, 0.0 }
  0xa1   :  { %27 = vadd.xlane.f32.xlu0 %v26_v20 }
  0xa3   :  { %v74_v23 = vpop.eup %73 }
  0xa4   :  { %v29_v25 = vsel %vm13_vm0, %v74_v23, 0.0 }
  0xa5   :  { %53 = vadd.xlane.f32.xlu0 %v52_v24  ;;  %30 = vadd.xlane.f32.xlu1 %v29_v25 }
  0xa9   :  { %56 = vadd.xlane.f32.xlu0 %v55_v27 }
 0x12e   :  { %v28_v28 = vpop.xlane.xlu0 %27 }
 0x12f   :  { %75 = vlog2.f32 %v28_v28 }
 0x132   :  { %v31_v29 = vpop.xlane.xlu1 %30  ;;  %v54_v31 = vpop.xlane.xlu0 %53 }
 0x133   :  { %77 = vlog2.f32 %v31_v29 }
 0x136   :  { %v57_v36 = vpop.xlane.xlu0 %56 }
 0x139   :  { %v76_v30 = vpop.eup %75 }
 0x13a   :  { %v33_v32 = vmul.f32 0.6931472, %v76_v30 }
 0x13c   :  { %v58_v33 = vsub.f32 %v33_v32, %v54_v31 }
 0x13d   :  { %v78_v34 = vpop.eup %77 }
 0x13e   :  { %61 = vst.msk [vmem:[%s122_s2] sm:$0xff] %vm60_vm3, %v58_v33  ;;  %v35_v35 = vmul.f32 0.6931472, %v78_v34 }
 0x140   :  { %v59_v37 = vsub.f32 %v35_v35, %v57_v36 }
 0x142   :  { %62 = vst.msk [vmem:[%s122_s2 + $0x8] sm:$0xff] %vm60_vm3, %v59_v37 }

</bundles_post_ra>
